<compile_context>
chip_gen: v5e
topology: v5e:2x2
jax: 0.10.0
libtpu: 0.0.40
codegen_flags: <defaults>
</compile_context>

<pallas_src>
import functools

import jax
import jax.numpy as jnp
import numpy as np
from jax import lax
from jax.experimental import pallas as pl
from jax.experimental.pallas import tpu as pltpu


# --------------------------------------------------------------------------- #
# Kernel
# --------------------------------------------------------------------------- #
def _gml_kernel(g_ref, x_ref, w1_ref, b1_ref, w2_ref, b2_ref, *rest,
                nonlin, norm_by_neighbors):
    # g_ref:  (TB, GS, N, N)   x_ref: (TB, N, C)
    # w1_ref: (GS, C, P)  b1_ref: (GS, 1, P)  w2_ref: (GS, P, P)  b2_ref: (GS, 1, P)
    # optional neigh_ref: (TB, GS, N, 1)      o_ref: (GS, TB, N, P)
    if norm_by_neighbors:
        neigh_ref, o_ref = rest
    else:
        (o_ref,) = rest

    TB, N, C = x_ref.shape
    GS = w1_ref.shape[0]
    P = w1_ref.shape[-1]
    cd = w1_ref.dtype                           # MXU compute dtype (bf16 / f32)

    # Tall (TB*N, C) slab for the MLP: fills the MXU M dimension.
    # (sublane-only dim merge; lane dim unchanged -> cheap)
    x2 = x_ref[...].reshape(TB * N, C)

    # GS is small and static -> unrolled Python loop; per-g ref slices are
    # static (zero-cost views), weights are already VMEM-resident.
    for g in range(GS):
        # ---- two-layer MLP (f32 accumulation, f32 bias/ReLU on the VPU).
        y = jnp.dot(x2, w1_ref[g], preferred_element_type=jnp.float32)
        y = jnp.maximum(y + b1_ref[g], 0.0)
        y = jnp.dot(y.astype(cd), w2_ref[g], preferred_element_type=jnp.float32)
        y = y + b2_ref[g]                                        # (TB*N, P) f32

        # ---- graph aggregation, batched over TB with explicit dims
        #      (no einsum relayouts): (TB,N,N) @ (TB,N,P) -> (TB,N,P).
        y3 = y.reshape(TB, N, P).astype(cd)
        gt = g_ref[:, g]                                         # (TB, N, N)
        out = lax.dot_general(
            gt, y3,
            dimension_numbers=(((2,), (1,)), ((0,), (0,))),
            preferred_element_type=jnp.float32)                  # (TB, N, P) f32

        if norm_by_neighbors:
            neigh = neigh_ref[:, g]            # (TB, N, 1), already clamped >= 1
            if norm_by_neighbors == "sqrt":
                out = out * lax.rsqrt(neigh)                     # EUP rsqrt
            else:
                out = out * pl.reciprocal(neigh, approx=True)    # EUP reciprocal

        if nonlin == "leakyrelu":
            out = jnp.where(out >= 0, out, 0.01 * out)
        elif nonlin == "sigmoid":
            out = jax.nn.sigmoid(out)
        elif nonlin == "tanh":
            out = jnp.tanh(out)

        o_ref[g] = out.astype(o_ref.dtype)


# --------------------------------------------------------------------------- #
# VMEM sizing helpers (real (sublane, lane) padded tile sizes)
# --------------------------------------------------------------------------- #
def _sublane(dtype):
    return {4: 8, 2: 16, 1: 32}[jnp.dtype(dtype).itemsize]


def _padded_bytes(shape, dtype):
    """VMEM footprint of a block, with last-dim padded to 128 lanes and
    second-to-last padded to the dtype's sublane tile."""
    sz = jnp.dtype(dtype).itemsize
    shape = tuple(int(s) for s in shape)
    if len(shape) < 2:
        shape = (1,) * (2 - len(shape)) + shape
    lead = int(np.prod(shape[:-2])) if len(shape) > 2 else 1
    s = -(-shape[-2] // _sublane(dtype)) * _sublane(dtype)
    l = -(-shape[-1] // 128) * 128
    return lead * s * l * sz


def _block_bytes(tb, GS, N, C, P, cd, out_dtype, norm_by_neighbors):
    b = _padded_bytes((tb, GS, N, N), cd)            # G block
    b += _padded_bytes((tb, N, C), cd)               # x block
    b += _padded_bytes((GS, tb, N, P), out_dtype)    # output block
    if norm_by_neighbors:
        b += _padded_bytes((tb, GS, N, 1), jnp.float32)
    return b


def _weight_bytes(GS, C, P, cd):
    return (_padded_bytes((GS, C, P), cd) + _padded_bytes((GS, P, P), cd)
            + 2 * _padded_bytes((GS, 1, P), jnp.float32))


def _vmem_capacity_bytes():
    try:
        return int(pltpu.get_tpu_info().vmem_capacity_bytes)
    except Exception:
        return 64 << 20          # conservative default (v7x per-TC VMEM)


def _pick_tb(B, GS, N, C, P, cd, out_dtype, norm_by_neighbors,
             budget_bytes, target_rows):
    """Largest TB <= B with TB*N ~<= target_rows whose padded blocks fit."""
    target_tb = max(1, target_rows // max(N, 1))
    tb = max(1, min(B, target_tb))

    def fits(t):
        blk = _block_bytes(t, GS, N, C, P, cd, out_dtype, norm_by_neighbors)
        wgt = _weight_bytes(GS, C, P, cd)
        interm = (2 * _padded_bytes((t * N, P), jnp.float32)
                  + _padded_bytes((t, N, P), jnp.float32))
        return 2 * blk + 2 * wgt + interm <= budget_bytes

    while tb > 1 and not fits(tb):
        tb -= 1
    return tb


# --------------------------------------------------------------------------- #
# Wrapper
# --------------------------------------------------------------------------- #
def graph_mat_layer_fast_pow2(G, x, params, *, mat_pow=1, mat_diag=False,
                              nonlin=None, norm_by_neighbors=False,
                              agg_func=None, compute_dtype=jnp.bfloat16,
                              tb=None):
    """Pallas implementation of GraphMatLayerFastPow2.forward.

    G: (B, GS, N, N)   x: (B, N, C)
    params: w1 (GS, C, P), b1 (GS, P), w2 (GS, P, P), b2 (GS, P)
    returns (GS, B, N, P), or aggregated over axis 0 if agg_func is given.
    """
    B, GS, N, _ = G.shape
    _, _, C = x.shape
    P = params["w1"].shape[-1]
    out_dtype = x.dtype
    cd = jnp.dtype(compute_dtype)
    o_sz = jnp.dtype(out_dtype).itemsize

    # ---- cheap data-independent glue (matrix power / diag mask) in the wrapper.
    Gprod = G
    for _ in range(mat_pow - 1):
        Gprod = jnp.einsum("ijkl,ijlm->ijkm", G, Gprod)
    if mat_diag:
        Gprod = jnp.eye(N, dtype=G.dtype)[None, None] * Gprod

    # ---- generation-aware budgets (25% VMEM headroom, smaller tiles on 64 MiB parts).
    capacity = _vmem_capacity_bytes()
    if capacity <= (64 << 20):
        tile_budget, target_rows = 18 << 20, 512        # v7x-class
    else:
        tile_budget, target_rows = 44 << 20, 1024       # v5e / v6e (128 MiB)

    if tb is not None:
        TB = max(1, int(tb))
    else:
        TB = _pick_tb(B, GS, N, C, P, cd, out_dtype, norm_by_neighbors,
                      tile_budget, target_rows)
    n_bt = pl.cdiv(B, TB)
    B_pad = n_bt * TB

    # ---- bf16 (or f32) MXU operands; biases stay f32 for the VPU adds.
    Gc = Gprod.astype(cd)                                    # natural (B,GS,N,N)
    xc = x.astype(cd)
    if norm_by_neighbors:
        # PyTorch uses the PRE-power G for neighbor counts.
        neigh = jnp.maximum(G.astype(jnp.float32).sum(-1), 1.0)[..., None]
    else:
        neigh = None

    if B_pad != B:                                           # pad awkward batch
        padB = B_pad - B
        Gc = jnp.pad(Gc, ((0, padB), (0, 0), (0, 0), (0, 0)))
        xc = jnp.pad(xc, ((0, padB), (0, 0), (0, 0)))
        if norm_by_neighbors:
            neigh = jnp.pad(neigh, ((0, padB), (0, 0), (0, 0), (0, 0)),
                            constant_values=1.0)

    w1 = params["w1"].astype(cd)
    w2 = params["w2"].astype(cd)
    b1 = params["b1"].reshape(GS, 1, P).astype(jnp.float32)
    b2 = params["b2"].reshape(GS, 1, P).astype(jnp.float32)

    # GS is folded into the kernel body: G / neigh stream contiguously in
    # natural layout, x streams exactly once, weights are resident (constant
    # block index across the whole grid).
    in_specs = [
        pl.BlockSpec((TB, GS, N, N), lambda bt: (bt, 0, 0, 0)),   # G (contiguous)
        pl.BlockSpec((TB, N, C),     lambda bt: (bt, 0, 0)),      # x (once)
        pl.BlockSpec((GS, C, P),     lambda bt: (0, 0, 0)),       # w1 (resident)
        pl.BlockSpec((GS, 1, P),     lambda bt: (0, 0, 0)),       # b1
        pl.BlockSpec((GS, P, P),     lambda bt: (0, 0, 0)),       # w2
        pl.BlockSpec((GS, 1, P),     lambda bt: (0, 0, 0)),       # b2
    ]
    inputs = [Gc, xc, w1, b1, w2, b2]
    if norm_by_neighbors:
        inputs.append(neigh)
        in_specs.append(pl.BlockSpec((TB, GS, N, 1), lambda bt: (bt, 0, 0, 0)))

    out_specs = pl.BlockSpec((GS, TB, N, P), lambda bt: (0, bt, 0, 0))

    # ---- VMEM limit with headroom (never the full physical VMEM).
    blk = _block_bytes(TB, GS, N, C, P, cd, out_dtype, norm_by_neighbors)
    wgt = _weight_bytes(GS, C, P, cd)
    need = 2 * blk + 2 * wgt + (4 << 20)
    vmem_limit = int(min(max(need, 16 << 20), capacity * 3 // 4))

    flops = 2 * B_pad * GS * N * (C * P + P * P + N * P)
    transcend = B_pad * GS * N * P if nonlin in ("sigmoid", "tanh") else 0
    bytes_accessed = int(Gc.size * cd.itemsize
                         + xc.size * cd.itemsize
                         + (w1.size + w2.size) * cd.itemsize
                         + (b1.size + b2.size) * 4
                         + GS * B_pad * N * P * o_sz
                         + (neigh.size * 4 if norm_by_neighbors else 0))

    kernel = functools.partial(_gml_kernel, nonlin=nonlin,
                               norm_by_neighbors=norm_by_neighbors)

    out = pl.pallas_call(
        kernel,
        out_shape=jax.ShapeDtypeStruct((GS, B_pad, N, P), out_dtype),
        grid_spec=pltpu.PrefetchScalarGridSpec(
            num_scalar_prefetch=0,
            grid=(n_bt,),
            in_specs=in_specs,
            out_specs=out_specs,
        ),
        compiler_params=pltpu.CompilerParams(
            dimension_semantics=("parallel",),
            vmem_limit_bytes=vmem_limit),
        cost_estimate=pl.CostEstimate(flops=flops,
                                      transcendentals=transcend,
                                      bytes_accessed=bytes_accessed),
    )(*inputs)

    if B_pad != B:
        out = out[:, :B]
    if agg_func is not None:
        out = agg_func(out, axis=0)
    return out


# --------------------------------------------------------------------------- #
# Pure-JAX reference (mirrors the PyTorch forward)
# --------------------------------------------------------------------------- #
def _reference(G, x, params, *, mat_pow=1, mat_diag=False, nonlin=None,
               norm_by_neighbors=False, agg_func=None,
               compute_dtype=jnp.float32):
    B, GS, N, _ = G.shape
    cd = jnp.dtype(compute_dtype)
    Gp = G
    for _ in range(mat_pow - 1):
        Gp = jnp.einsum("ijkl,ijlm->ijkm", G, Gp)
    if mat_diag:
        Gp = jnp.eye(N, dtype=G.dtype)[None, None] * Gp
    ys = []
    for g in range(GS):
        y = jnp.dot(x.astype(cd), params["w1"][g].astype(cd),
                    preferred_element_type=jnp.float32) + params["b1"][g]
        y = jnp.maximum(y, 0.0)
        y = jnp.dot(y.astype(cd), params["w2"][g].astype(cd),
                    preferred_element_type=jnp.float32) + params["b2"][g]
        ys.append(y)
    multi = jnp.stack(ys, 0)                                        # (GS, B, N, P)
    xout = jnp.einsum("ijkl,jilm->jikm", Gp.astype(cd), multi.astype(cd),
                      preferred_element_type=jnp.float32)
    if norm_by_neighbors:
        neigh = jnp.maximum(G.sum(-1), 1.0).transpose(1, 0, 2)[..., None]
        if norm_by_neighbors == "sqrt":
            xout = xout / jnp.sqrt(neigh)
        else:
            xout = xout / neigh
    if nonlin == "leakyrelu":
        xout = jnp.where(xout >= 0, xout, 0.01 * xout)
    elif nonlin == "sigmoid":
        xout = jax.nn.sigmoid(xout)
    elif nonlin == "tanh":
        xout = jnp.tanh(xout)
    if agg_func is not None:
        xout = agg_func(xout, axis=0)
    return xout


# --------------------------------------------------------------------------- #
# Demo / self-test
# --------------------------------------------------------------------------- #
if __name__ == "__main__":
    # Small shapes consistent with the module: B=2 graphs, GS=2 graph channels,
    # MAX_N=16 nodes, C=8 input features, P=16 output features.
    B, GS, N, C, P = 2, 2, 16, 8, 16

    key = jax.random.PRNGKey(0)
    kG, kx, k1, k2, k3, k4 = jax.random.split(key, 6)

    G = (jax.random.uniform(kG, (B, GS, N, N)) > 0.7).astype(jnp.float32)
    x = jax.random.normal(kx, (B, N, C), dtype=jnp.float32)

    params = {
        "w1": jax.random.normal(k1, (GS, C, P), jnp.float32) * (1.0 / np.sqrt(C)),
        "b1": jax.random.normal(k2, (GS, P), jnp.float32) * 0.1,
        "w2": jax.random.normal(k3, (GS, P, P), jnp.float32) * (1.0 / np.sqrt(P)),
        "b2": jax.random.normal(k4, (GS, P), jnp.float32) * 0.1,
    }

    # 1) default config, f32 compute: tight check against PyTorch-equivalent ref.
    out32 = jax.block_until_ready(
        graph_mat_layer_fast_pow2(G, x, params, compute_dtype=jnp.float32))
    ref32 = _reference(G, x, params, compute_dtype=jnp.float32)
    np.testing.assert_allclose(np.asarray(out32), np.asarray(ref32),
                               rtol=1e-4, atol=1e-4)
    assert out32.shape == (GS, B, N, P)

    # 2) default config, bf16 MXU operands (production path): compare against a
    #    reference using the same bf16 operands + f32 accumulation.
    out_bf = jax.block_until_ready(graph_mat_layer_fast_pow2(G, x, params))
    ref_bf = _reference(G, x, params, compute_dtype=jnp.bfloat16)
    np.testing.assert_allclose(np.asarray(out_bf), np.asarray(ref_bf),
                               rtol=1e-2, atol=1e-2)

    # 3) mat_pow / sqrt neighbor norm (EUP rsqrt) / tanh / agg_func (f32).
    out_cfg = jax.block_until_ready(
        graph_mat_layer_fast_pow2(G, x, params, mat_pow=2, nonlin="tanh",
                                  norm_by_neighbors="sqrt", agg_func=jnp.sum,
                                  compute_dtype=jnp.float32))
    ref_cfg = _reference(G, x, params, mat_pow=2, nonlin="tanh",
                         norm_by_neighbors="sqrt", agg_func=jnp.sum,
                         compute_dtype=jnp.float32)
    np.testing.assert_allclose(np.asarray(out_cfg), np.asarray(ref_cfg),
                               rtol=2e-3, atol=2e-3)

    # 4) plain neighbor norm (EUP approximate reciprocal) + leakyrelu (f32).
    out_nn = jax.block_until_ready(
        graph_mat_layer_fast_pow2(G, x, params, nonlin="leakyrelu",
                                  norm_by_neighbors=True,
                                  compute_dtype=jnp.float32))
    ref_nn = _reference(G, x, params, nonlin="leakyrelu",
                        norm_by_neighbors=True, compute_dtype=jnp.float32)
    np.testing.assert_allclose(np.asarray(out_nn), np.asarray(ref_nn),
                               rtol=1e-2, atol=1e-2)

    # 5) batch padding path: B=3 with forced TB=2 -> B_pad=4, grid=(2,).
    B3 = 3
    G3 = (jax.random.uniform(kG, (B3, GS, N, N)) > 0.7).astype(jnp.float32)
    x3 = jax.random.normal(kx, (B3, N, C), dtype=jnp.float32)
    out_pad = jax.block_until_ready(
        graph_mat_layer_fast_pow2(G3, x3, params, compute_dtype=jnp.float32,
                                  tb=2))
    ref_pad = _reference(G3, x3, params, compute_dtype=jnp.float32)
    np.testing.assert_allclose(np.asarray(out_pad), np.asarray(ref_pad),
                               rtol=1e-4, atol=1e-4)
    assert out_pad.shape == (GS, B3, N, P)

    print("KERNEL_OK")
</pallas_src>

<mosaic_0001>
module attributes {stable_mosaic.version = 11 : i64} {
  func.func @_gml_kernel(%arg0: i32, %arg1: memref<2x2x16x16xf32, #tpu.memory_space<vmem>>, %arg2: memref<2x16x8xf32, #tpu.memory_space<vmem>>, %arg3: memref<2x8x16xf32, #tpu.memory_space<vmem>>, %arg4: memref<2x1x16xf32, #tpu.memory_space<vmem>>, %arg5: memref<2x16x16xf32, #tpu.memory_space<vmem>>, %arg6: memref<2x1x16xf32, #tpu.memory_space<vmem>>, %arg7: memref<2x2x16x16xf32, #tpu.memory_space<vmem>>) attributes {dimension_semantics = [#tpu.dimension_semantics<parallel>], iteration_bounds = array<i64: 1>, scalar_prefetch = 0 : i64, scratch_operands = 0 : i64, tpu.core_type = #tpu.core_type<tc>, window_params = [{transform_indices = @transform_0, window_bounds = array<i64: 2, 2, 16, 16>}, {transform_indices = @transform_1, window_bounds = array<i64: 2, 16, 8>}, {pipeline_mode = #tpu.pipeline_mode<synchronous>, transform_indices = @transform_2, window_bounds = array<i64: 2, 8, 16>}, {pipeline_mode = #tpu.pipeline_mode<synchronous>, transform_indices = @transform_3, window_bounds = array<i64: 2, 1, 16>}, {pipeline_mode = #tpu.pipeline_mode<synchronous>, transform_indices = @transform_4, window_bounds = array<i64: 2, 16, 16>}, {pipeline_mode = #tpu.pipeline_mode<synchronous>, transform_indices = @transform_5, window_bounds = array<i64: 2, 1, 16>}, {transform_indices = @transform_6, window_bounds = array<i64: 2, 2, 16, 16>}]} {
    %c0 = arith.constant 0 : index
    %c0_0 = arith.constant 0 : index
    %c0_1 = arith.constant 0 : index
    %0 = vector.load %arg2[%c0, %c0_0, %c0_1] : memref<2x16x8xf32, #tpu.memory_space<vmem>>, vector<2x16x8xf32>
    %1 = vector.shape_cast %0 : vector<2x16x8xf32> to vector<32x8xf32>
    %c0_2 = arith.constant 0 : index
    %c0_3 = arith.constant 0 : index
    %c0_4 = arith.constant 0 : index
    %2 = vector.load %arg3[%c0_2, %c0_3, %c0_4] : memref<2x8x16xf32, #tpu.memory_space<vmem>>, vector<1x8x16xf32>
    %3 = vector.shape_cast %2 : vector<1x8x16xf32> to vector<8x16xf32>
    %cst = arith.constant dense<0.000000e+00> : vector<32x16xf32>
    %4 = tpu.matmul %1, %3, %cst {dimension_numbers = #tpu.dot_dimension_numbers<[1], [0], [0], [1], [0, 0, 1, 1], [], []>} : vector<32x8xf32>, vector<8x16xf32>, vector<32x16xf32> -> vector<32x16xf32>
    %c0_5 = arith.constant 0 : index
    %c0_6 = arith.constant 0 : index
    %c0_7 = arith.constant 0 : index
    %5 = vector.load %arg4[%c0_5, %c0_6, %c0_7] : memref<2x1x16xf32, #tpu.memory_space<vmem>>, vector<1x1x16xf32>
    %6 = vector.shape_cast %5 : vector<1x1x16xf32> to vector<1x16xf32>
    %7 = vector.broadcast %6 : vector<1x16xf32> to vector<32x16xf32>
    %8 = arith.addf %4, %7 : vector<32x16xf32>
    %cst_8 = arith.constant 0.000000e+00 : f32
    %9 = vector.broadcast %cst_8 : f32 to vector<32x16xf32>
    %10 = arith.maximumf %8, %9 : vector<32x16xf32>
    %c0_9 = arith.constant 0 : index
    %c0_10 = arith.constant 0 : index
    %c0_11 = arith.constant 0 : index
    %11 = vector.load %arg5[%c0_9, %c0_10, %c0_11] : memref<2x16x16xf32, #tpu.memory_space<vmem>>, vector<1x16x16xf32>
    %12 = vector.shape_cast %11 : vector<1x16x16xf32> to vector<16x16xf32>
    %cst_12 = arith.constant dense<0.000000e+00> : vector<32x16xf32>
    %13 = tpu.matmul %10, %12, %cst_12 {dimension_numbers = #tpu.dot_dimension_numbers<[1], [0], [0], [1], [0, 0, 1, 1], [], []>} : vector<32x16xf32>, vector<16x16xf32>, vector<32x16xf32> -> vector<32x16xf32>
    %c0_13 = arith.constant 0 : index
    %c0_14 = arith.constant 0 : index
    %c0_15 = arith.constant 0 : index
    %14 = vector.load %arg6[%c0_13, %c0_14, %c0_15] : memref<2x1x16xf32, #tpu.memory_space<vmem>>, vector<1x1x16xf32>
    %15 = vector.shape_cast %14 : vector<1x1x16xf32> to vector<1x16xf32>
    %16 = vector.broadcast %15 : vector<1x16xf32> to vector<32x16xf32>
    %17 = arith.addf %13, %16 : vector<32x16xf32>
    %18 = vector.shape_cast %17 : vector<32x16xf32> to vector<2x16x16xf32>
    %c0_16 = arith.constant 0 : index
    %c0_17 = arith.constant 0 : index
    %c0_18 = arith.constant 0 : index
    %c0_19 = arith.constant 0 : index
    %19 = vector.load %arg1[%c0_16, %c0_17, %c0_18, %c0_19] : memref<2x2x16x16xf32, #tpu.memory_space<vmem>>, vector<2x1x16x16xf32>
    %20 = vector.shape_cast %19 : vector<2x1x16x16xf32> to vector<2x16x16xf32>
    %cst_20 = arith.constant dense<0.000000e+00> : vector<2x16x16xf32>
    %21 = tpu.matmul %20, %18, %cst_20 {dimension_numbers = #tpu.dot_dimension_numbers<[2], [1], [1], [2], [0, 0, 0, 1, 1, 2], [0], [0]>} : vector<2x16x16xf32>, vector<2x16x16xf32>, vector<2x16x16xf32> -> vector<2x16x16xf32>
    %c0_21 = arith.constant 0 : index
    %c0_22 = arith.constant 0 : index
    %c0_23 = arith.constant 0 : index
    %c0_24 = arith.constant 0 : index
    %22 = vector.load %arg7[%c0_21, %c0_22, %c0_23, %c0_24] : memref<2x2x16x16xf32, #tpu.memory_space<vmem>>, vector<1x2x16x16xf32>
    %23 = vector.shape_cast %22 : vector<1x2x16x16xf32> to vector<2x16x16xf32>
    %24 = vector.shape_cast %21 : vector<2x16x16xf32> to vector<1x2x16x16xf32>
    tpu.vector_store %arg7[%c0_21, %c0_22, %c0_23, %c0_24], %24 {strides = array<i32>} : memref<2x2x16x16xf32, #tpu.memory_space<vmem>>, vector<1x2x16x16xf32>,
    %c1 = arith.constant 1 : index
    %c0_25 = arith.constant 0 : index
    %c0_26 = arith.constant 0 : index
    %25 = vector.load %arg3[%c1, %c0_25, %c0_26] : memref<2x8x16xf32, #tpu.memory_space<vmem>>, vector<1x8x16xf32>
    %26 = vector.shape_cast %25 : vector<1x8x16xf32> to vector<8x16xf32>
    %cst_27 = arith.constant dense<0.000000e+00> : vector<32x16xf32>
    %27 = tpu.matmul %1, %26, %cst_27 {dimension_numbers = #tpu.dot_dimension_numbers<[1], [0], [0], [1], [0, 0, 1, 1], [], []>} : vector<32x8xf32>, vector<8x16xf32>, vector<32x16xf32> -> vector<32x16xf32>
    %c1_28 = arith.constant 1 : index
    %c0_29 = arith.constant 0 : index
    %c0_30 = arith.constant 0 : index
    %28 = vector.load %arg4[%c1_28, %c0_29, %c0_30] : memref<2x1x16xf32, #tpu.memory_space<vmem>>, vector<1x1x16xf32>
    %29 = vector.shape_cast %28 : vector<1x1x16xf32> to vector<1x16xf32>
    %30 = vector.broadcast %29 : vector<1x16xf32> to vector<32x16xf32>
    %31 = arith.addf %27, %30 : vector<32x16xf32>
    %cst_31 = arith.constant 0.000000e+00 : f32
    %32 = vector.broadcast %cst_31 : f32 to vector<32x16xf32>
    %33 = arith.maximumf %31, %32 : vector<32x16xf32>
    %c1_32 = arith.constant 1 : index
    %c0_33 = arith.constant 0 : index
    %c0_34 = arith.constant 0 : index
    %34 = vector.load %arg5[%c1_32, %c0_33, %c0_34] : memref<2x16x16xf32, #tpu.memory_space<vmem>>, vector<1x16x16xf32>
    %35 = vector.shape_cast %34 : vector<1x16x16xf32> to vector<16x16xf32>
    %cst_35 = arith.constant dense<0.000000e+00> : vector<32x16xf32>
    %36 = tpu.matmul %33, %35, %cst_35 {dimension_numbers = #tpu.dot_dimension_numbers<[1], [0], [0], [1], [0, 0, 1, 1], [], []>} : vector<32x16xf32>, vector<16x16xf32>, vector<32x16xf32> -> vector<32x16xf32>
    %c1_36 = arith.constant 1 : index
    %c0_37 = arith.constant 0 : index
    %c0_38 = arith.constant 0 : index
    %37 = vector.load %arg6[%c1_36, %c0_37, %c0_38] : memref<2x1x16xf32, #tpu.memory_space<vmem>>, vector<1x1x16xf32>
    %38 = vector.shape_cast %37 : vector<1x1x16xf32> to vector<1x16xf32>
    %39 = vector.broadcast %38 : vector<1x16xf32> to vector<32x16xf32>
    %40 = arith.addf %36, %39 : vector<32x16xf32>
    %41 = vector.shape_cast %40 : vector<32x16xf32> to vector<2x16x16xf32>
    %c0_39 = arith.constant 0 : index
    %c1_40 = arith.constant 1 : index
    %c0_41 = arith.constant 0 : index
    %c0_42 = arith.constant 0 : index
    %42 = vector.load %arg1[%c0_39, %c1_40, %c0_41, %c0_42] : memref<2x2x16x16xf32, #tpu.memory_space<vmem>>, vector<2x1x16x16xf32>
    %43 = vector.shape_cast %42 : vector<2x1x16x16xf32> to vector<2x16x16xf32>
    %cst_43 = arith.constant dense<0.000000e+00> : vector<2x16x16xf32>
    %44 = tpu.matmul %43, %41, %cst_43 {dimension_numbers = #tpu.dot_dimension_numbers<[2], [1], [1], [2], [0, 0, 0, 1, 1, 2], [0], [0]>} : vector<2x16x16xf32>, vector<2x16x16xf32>, vector<2x16x16xf32> -> vector<2x16x16xf32>
    %c1_44 = arith.constant 1 : index
    %c0_45 = arith.constant 0 : index
    %c0_46 = arith.constant 0 : index
    %c0_47 = arith.constant 0 : index
    %45 = vector.load %arg7[%c1_44, %c0_45, %c0_46, %c0_47] : memref<2x2x16x16xf32, #tpu.memory_space<vmem>>, vector<1x2x16x16xf32>
    %46 = vector.shape_cast %45 : vector<1x2x16x16xf32> to vector<2x16x16xf32>
    %47 = vector.shape_cast %44 : vector<2x16x16xf32> to vector<1x2x16x16xf32>
    tpu.vector_store %arg7[%c1_44, %c0_45, %c0_46, %c0_47], %47 {strides = array<i32>} : memref<2x2x16x16xf32, #tpu.memory_space<vmem>>, vector<1x2x16x16xf32>,
    return
  }
  func.func @transform_0(%arg0: i32) -> (i32, i32, i32, i32) {
    %c0_i32 = arith.constant 0 : i32
    %c0_i32_0 = arith.constant 0 : i32
    %c0_i32_1 = arith.constant 0 : i32
    %c0_i32_2 = arith.constant 0 : i32
    return %arg0, %c0_i32, %c0_i32_0, %c0_i32_1 : i32, i32, i32, i32
  }
  func.func @transform_1(%arg0: i32) -> (i32, i32, i32) {
    %c0_i32 = arith.constant 0 : i32
    %c0_i32_0 = arith.constant 0 : i32
    %c0_i32_1 = arith.constant 0 : i32
    return %arg0, %c0_i32, %c0_i32_0 : i32, i32, i32
  }
  func.func @transform_2(%arg0: i32) -> (i32, i32, i32) {
    %c0_i32 = arith.constant 0 : i32
    %c0_i32_0 = arith.constant 0 : i32
    %c0_i32_1 = arith.constant 0 : i32
    %c0_i32_2 = arith.constant 0 : i32
    return %c0_i32, %c0_i32_0, %c0_i32_1 : i32, i32, i32
  }
  func.func @transform_3(%arg0: i32) -> (i32, i32, i32) {
    %c0_i32 = arith.constant 0 : i32
    %c0_i32_0 = arith.constant 0 : i32
    %c0_i32_1 = arith.constant 0 : i32
    %c0_i32_2 = arith.constant 0 : i32
    return %c0_i32, %c0_i32_0, %c0_i32_1 : i32, i32, i32
  }
  func.func @transform_4(%arg0: i32) -> (i32, i32, i32) {
    %c0_i32 = arith.constant 0 : i32
    %c0_i32_0 = arith.constant 0 : i32
    %c0_i32_1 = arith.constant 0 : i32
    %c0_i32_2 = arith.constant 0 : i32
    return %c0_i32, %c0_i32_0, %c0_i32_1 : i32, i32, i32
  }
  func.func @transform_5(%arg0: i32) -> (i32, i32, i32) {
    %c0_i32 = arith.constant 0 : i32
    %c0_i32_0 = arith.constant 0 : i32
    %c0_i32_1 = arith.constant 0 : i32
    %c0_i32_2 = arith.constant 0 : i32
    return %c0_i32, %c0_i32_0, %c0_i32_1 : i32, i32, i32
  }
  func.func @transform_6(%arg0: i32) -> (i32, i32, i32, i32) {
    %c0_i32 = arith.constant 0 : i32
    %c0_i32_0 = arith.constant 0 : i32
    %c0_i32_1 = arith.constant 0 : i32
    %c0_i32_2 = arith.constant 0 : i32
    return %c0_i32, %arg0, %c0_i32_0, %c0_i32_1 : i32, i32, i32, i32
  }
}

</mosaic_0001>

<bundles_post_ra>
// kernel: tpu_custom_call.1
= control target key start
LH: loop header
LB: loop body
LE: loop exit
PB: predicated region body
PF: predicated region fallthrough
CT: control target
= control target key end

     0   :  { %11 = vsyncpa [#allocation3], 0  ;;  %s599_s0 = inlined_call_operand.hbm [shape: f32[2,2,16,16], index: 0, kind: input, shape index: {}]   ;;  %s600_s1 = inlined_call_operand.vmem [shape: f32[2,16,8], index: 1, kind: input, shape index: {}]   ;;  %s601_s2 = inlined_call_operand.vmem [shape: f32[2,8,16], index: 2, kind: input, shape index: {}]   ;;  %s602_s3 = inlined_call_operand.vmem [shape: f32[2,1,16], index: 3, kind: input, shape index: {}]   ;;  %s603_s4 = inlined_call_operand.vmem [shape: f32[2,16,16], index: 4, kind: input, shape index: {}]   ;;  %s604_s5 = inlined_call_operand.vmem [shape: f32[2,1,16], index: 5, kind: input, shape index: {}]   ;;  %s605_s6 = inlined_call_operand.hbm [shape: f32[2,2,16,16], index: 6, kind: output, shape index: {}]  }
   0x1   :  { %12 = vsyncpa [#allocation4], 0  ;;  %s17_s23 = sshll.u32 %s599_s0, 4  ;;  %s474_s24 = smov [#allocation2]   ;;  %s18_s23 = int_to_ptr.hbm [resolvable:$true] %s17_s23 }
   0x2   :  { %s19_s25 = sshll.u32 %s474_s24, 4  ;;  %s475_s26 = smov 128   ;;  %s20_s25 = int_to_ptr.vmem [resolvable:$true] %s19_s25 }
   0x3   :  { %s476_s27 = smov 8  }
   0x4   :  { %25 = dma.hbm_to_vmem [thread:$0]  %s18_s23, 1024, %s20_s25, [#allocation3], %s475_s26, %s475_s26, %s476_s27  }
   0x5   :  { %470 = dma.done.wait [#allocation3], 1024  }
   0x6   :  { %471 = vsyncadd [#allocation3], 4294966272  ;;  %vm49_vm0 = vcmask 64512   ;;  %v44_v0 = vld [vmem:[%s601_s2] sm:$0xff]  ;;  %v41_v2 = vld [vmem:[%s600_s1 + $0x8] sm:$0xff]  ;;  %vm101_vm1 = vcmask 130048  }
   0x7   :  { %v40_v1 = vld [vmem:[%s600_s1] sm:$0xff]  ;;  %77 = vmatpush.msra.mxu0 %v44_v0  ;;  %v42_v3 = vld [vmem:[%s600_s1 + $0x10] sm:$0xff]  ;;  %v96_v4 = vld [vmem:[%s603_s4 + $0x8] sm:$0xff]  ;;  %s372_s0 = sshll.u32 %s605_s6, 4  ;;  %s373_s0 = int_to_ptr.hbm [resolvable:$true] %s372_s0 }
   0x8   :  { %385 = vmatmul.msk.f32.vlgmr.msra.gmra.mxu0 %vm49_vm0, %v40_v1  ;;  %128 = vmatpush.msra.mxu1 %v96_v4  ;;  %v95_v5 = vld [vmem:[%s603_s4] sm:$0xff]  ;;  %v43_v6 = vld [vmem:[%s600_s1 + $0x18] sm:$0xff]  ;;  %v397_v26 = vld [vmem:[%s601_s2 + $0x8] sm:$0xff] }
   0x9   :  { %v418_v7 = vld [vmem:[%s602_s3] ss:$0 sm:$0xff]  ;;  %v144_v27 = vld [vmem:[#allocation2 + $0x8] sm:$0xff]  ;;  %v404_v34 = vld [vmem:[%s603_s4 + $0x18] sm:$0xff] }
   0xa   :  { %129 = vmatpush.msra.mxu1 %v95_v5  ;;  %v419_v21 = vld [vmem:[%s604_s5] ss:$0 sm:$0xff]  ;;  %v146_v33 = vld [vmem:[#allocation2 + $0x28] sm:$0xff]  ;;  %v403_v35 = vld [vmem:[%s603_s4 + $0x10] sm:$0xff] }
   0xb   :  { %v143_v25 = vld [vmem:[#allocation2] sm:$0xff]  ;;  %v299_v58 = vld [vmem:[#allocation2 + $0x10] sm:$0xff]  ;;  %v300_v60 = vld [vmem:[#allocation2 + $0x18] sm:$0xff] }
   0xc   :  { %v145_v32 = vld [vmem:[#allocation2 + $0x20] sm:$0xff]  ;;  %v301_v0 = vld [vmem:[#allocation2 + $0x30] sm:$0xff] }
   0xd   :  { %v420_v38 = vld [vmem:[%s602_s3 + $0x1] ss:$0 sm:$0xff] }
   0xe   :  { %v421_v54 = vld [vmem:[%s604_s5 + $0x1] ss:$0 sm:$0xff]  ;;  %s477_s5 = smov [#allocation5]  }
   0xf   :  { %s370_s29 = sshll.u32 %s477_s5, 4  ;;  %s371_s29 = int_to_ptr.vmem [resolvable:$true] %s370_s29 }
  0x10   :  { %386 = vmatmul.msk.f32.gmra.mxu0 %vm49_vm0, %v41_v2 }
  0x18   :  { %387 = vmatmul.msk.f32.gmra.mxu0 %vm49_vm0, %v42_v3 }
  0x20   :  { %388 = vmatmul.msk.f32.gmra.mxu0 %vm49_vm0, %v43_v6 }
  0x85   :  { %v79_v8 = vpop.f32.mrf.mxu0 }
  0x86   :  { %v80_v9 = vadd.f32 %v418_v7, %v79_v8 }
  0x88   :  { %v91_v10 = vmax.f32 %v80_v9, 0.0 }
  0x8a   :  { %389 = vmatmul.msk.f32.vlgmr.msra.gmra.mxu1 %vm101_vm1, %v91_v10 }
  0x8d   :  { %v82_v11 = vpop.f32.mrf.mxu0 }
  0x8e   :  { %v83_v12 = vadd.f32 %v418_v7, %v82_v11 }
  0x90   :  { %v92_v13 = vmax.f32 %v83_v12, 0.0 }
  0x92   :  { %390 = vmatmul.msk.f32.gmra.mxu1 %vm101_vm1, %v92_v13 }
  0x95   :  { %v85_v14 = vpop.f32.mrf.mxu0 }
  0x96   :  { %v86_v15 = vadd.f32 %v418_v7, %v85_v14 }
  0x98   :  { %v93_v16 = vmax.f32 %v86_v15, 0.0 }
  0x9a   :  { %391 = vmatmul.msk.f32.gmra.mxu1 %vm101_vm1, %v93_v16 }
  0x9d   :  { %v88_v17 = vpop.f32.mrf.mxu0 }
  0x9e   :  { %v89_v18 = vadd.f32 %v418_v7, %v88_v17 }
  0xa0   :  { %v94_v19 = vmax.f32 %v89_v18, 0.0 }
  0xa2   :  { %392 = vmatmul.msk.f32.gmra.mxu1 %vm101_vm1, %v94_v19 }
 0x107   :  { %v131_v20 = vpop.f32.mrf.mxu1 }
 0x108   :  { %v132_v24 = vadd.f32 %v419_v21, %v131_v20 }
 0x10f   :  { %v134_v22 = vpop.f32.mrf.mxu1 }
 0x110   :  { %v135_v23 = vadd.f32 %v419_v21, %v134_v22 }
 0x112   :  { %167 = vmatpush.msra.mxu2 %v135_v23 }
 0x114   :  { %168 = vmatpush.msra.mxu2 %v132_v24 }
 0x115   :  { %393 = vmatmul.msk.f32.vlgmr.msra.gmra.mxu2 %vm101_vm1, %v143_v25 }
 0x116   :  { %231 = vmatpush.msrb.mxu2 %v397_v26 }
 0x117   :  { %v137_v28 = vpop.f32.mrf.mxu1 }
 0x118   :  { %v138_v30 = vadd.f32 %v419_v21, %v137_v28 }
 0x11d   :  { %394 = vmatmul.msk.f32.gmra.mxu2 %vm101_vm1, %v144_v27 }
 0x11f   :  { %v140_v29 = vpop.f32.mrf.mxu1 }
 0x120   :  { %v141_v31 = vadd.f32 %v419_v21, %v140_v29 }
 0x122   :  { %196 = vmatpush.msra.mxu3 %v141_v31 }
 0x124   :  { %197 = vmatpush.msra.mxu3 %v138_v30 }
 0x125   :  { %399 = vmatmul.msk.f32.vlgmr.msrb.gmra.mxu2 %vm49_vm0, %v40_v1  ;;  %395 = vmatmul.msk.f32.vlgmr.msra.gmra.mxu3 %vm101_vm1, %v145_v32  ;;  %v302_v1 = vld [vmem:[#allocation2 + $0x38] sm:$0xff] }
 0x126   :  { %283 = vmatpush.msrb.mxu3 %v404_v34 }
 0x128   :  { %284 = vmatpush.msrb.mxu3 %v403_v35 }
 0x12d   :  { %400 = vmatmul.msk.f32.gmra.mxu2 %vm49_vm0, %v41_v2  ;;  %396 = vmatmul.msk.f32.gmra.mxu3 %vm101_vm1, %v146_v33 }
 0x135   :  { %401 = vmatmul.msk.f32.gmra.mxu2 %vm49_vm0, %v42_v3 }
 0x13d   :  { %402 = vmatmul.msk.f32.gmra.mxu2 %vm49_vm0, %v43_v6 }
 0x198   :  { %v170_v36 = vpop.f32.mrf.mxu2 }
 0x199   :  { %205 = vst.msk [vmem:[#allocation5] sm:$0xff] %vm101_vm1, %v170_v36 }
 0x1a0   :  { %v173_v37 = vpop.f32.mrf.mxu2 }
 0x1a1   :  { %206 = vst.msk [vmem:[#allocation5 + $0x8] sm:$0xff] %vm101_vm1, %v173_v37 }
 0x1a8   :  { %v233_v39 = vpop.f32.mrf.mxu2  ;;  %v199_v51 = vpop.f32.mrf.mxu3 }
 0x1a9   :  { %v234_v40 = vadd.f32 %v420_v38, %v233_v39  ;;  %207 = vst.msk [vmem:[#allocation5 + $0x10] sm:$0xff] %vm101_vm1, %v199_v51 }
 0x1ab   :  { %v245_v41 = vmax.f32 %v234_v40, 0.0 }
 0x1ad   :  { %406 = vmatmul.msk.f32.vlgmr.msrb.gmra.mxu3 %vm101_vm1, %v245_v41 }
 0x1b0   :  { %v236_v42 = vpop.f32.mrf.mxu2  ;;  %v202_v52 = vpop.f32.mrf.mxu3 }
 0x1b1   :  { %v237_v43 = vadd.f32 %v420_v38, %v236_v42  ;;  %208 = vst.msk [vmem:[#allocation5 + $0x18] sm:$0xff] %vm101_vm1, %v202_v52 }
 0x1b3   :  { %v246_v44 = vmax.f32 %v237_v43, 0.0 }
 0x1b5   :  { %407 = vmatmul.msk.f32.gmra.mxu3 %vm101_vm1, %v246_v44 }
 0x1b8   :  { %v239_v45 = vpop.f32.mrf.mxu2 }
 0x1b9   :  { %v240_v46 = vadd.f32 %v420_v38, %v239_v45 }
 0x1bb   :  { %v247_v47 = vmax.f32 %v240_v46, 0.0 }
 0x1bd   :  { %408 = vmatmul.msk.f32.gmra.mxu3 %vm101_vm1, %v247_v47 }
 0x1c0   :  { %v242_v48 = vpop.f32.mrf.mxu2 }
 0x1c1   :  { %v243_v49 = vadd.f32 %v420_v38, %v242_v48 }
 0x1c3   :  { %v248_v50 = vmax.f32 %v243_v49, 0.0 }
 0x1c5   :  { %409 = vmatmul.msk.f32.gmra.mxu3 %vm101_vm1, %v248_v50 }
 0x230   :  { %v286_v53 = vpop.f32.mrf.mxu3 }
 0x231   :  { %v287_v57 = vadd.f32 %v421_v54, %v286_v53 }
 0x238   :  { %v289_v55 = vpop.f32.mrf.mxu3 }
 0x239   :  { %v290_v56 = vadd.f32 %v421_v54, %v289_v55 }
 0x23b   :  { %323 = vmatpush.msrb.mxu0 %v290_v56 }
 0x23d   :  { %324 = vmatpush.msrb.mxu0 %v287_v57 }
 0x23e   :  { %410 = vmatmul.msk.f32.vlgmr.msrb.gmra.mxu0 %vm101_vm1, %v299_v58 }
 0x240   :  { %v292_v59 = vpop.f32.mrf.mxu3 }
 0x241   :  { %v293_v63 = vadd.f32 %v421_v54, %v292_v59 }
 0x246   :  { %411 = vmatmul.msk.f32.gmra.mxu0 %vm101_vm1, %v300_v60 }
 0x248   :  { %v295_v61 = vpop.f32.mrf.mxu3 }
 0x249   :  { %v296_v62 = vadd.f32 %v421_v54, %v295_v61 }
 0x24b   :  { %352 = vmatpush.msrb.mxu1 %v296_v62 }
 0x24d   :  { %353 = vmatpush.msrb.mxu1 %v293_v63 }
 0x24e   :  { %412 = vmatmul.msk.f32.vlgmr.msrb.gmra.mxu1 %vm101_vm1, %v301_v0 }
 0x256   :  { %413 = vmatmul.msk.f32.gmra.mxu1 %vm101_vm1, %v302_v1 }
 0x2bb   :  { %v326_v2 = vpop.f32.mrf.mxu0 }
 0x2bc   :  { %362 = vst.msk [vmem:[#allocation5 + $0x20] sm:$0xff] %vm101_vm1, %v326_v2 }
 0x2c3   :  { %v329_v3 = vpop.f32.mrf.mxu0 }
 0x2c4   :  { %363 = vst.msk [vmem:[#allocation5 + $0x28] sm:$0xff] %vm101_vm1, %v329_v3 }
 0x2cb   :  { %v355_v4 = vpop.f32.mrf.mxu1 }
 0x2cc   :  { %364 = vst.msk [vmem:[#allocation5 + $0x30] sm:$0xff] %vm101_vm1, %v355_v4 }
 0x2d3   :  { %v358_v5 = vpop.f32.mrf.mxu1 }
 0x2d4   :  { %365 = vst.msk [vmem:[#allocation5 + $0x38] sm:$0xff] %vm101_vm1, %v358_v5 }
 0x2d5   :  { %378 = dma.vmem_to_hbm [thread:$0]  %s371_s29, 1024, %s373_s0, [#allocation4], %s475_s26, %s475_s26, %s476_s27  }
 0x2d6   :  { %472 = dma.done.wait [#allocation4], 1024  }
 0x2d7   :  { %473 = vsyncadd [#allocation4], 4294966272 }
 0x2d8   :  { %383 = vsyncpa [#allocation3], 1 }
 0x2d9   :  { %384 = vsyncpa [#allocation4], 1 }

</bundles_post_ra>
